<compile_context>
chip_gen: v5e
topology: v5e:2x2
jax: 0.10.0
libtpu: 0.0.40
codegen_flags: <defaults>
</compile_context>

<pallas_src>
import functools

import jax
import jax.numpy as jnp
from jax.experimental import pallas as pl
from jax.experimental.pallas import tpu as pltpu


# ---------------------------------------------------------------------------
# Kernels
# ---------------------------------------------------------------------------
def _stats_kernel(x_ref, mean_ref, m2_ref, pivot_ref, *, hw, lane_tile):
    """Per-row pivot-shifted sums, finalized to (mean, M2) on the last column.

    mean_ref / m2_ref hold the running shifted sum / shifted sum-of-squares
    while the column axis iterates; on the last column tile they are rewritten
    in place to the per-row mean and M2 (sum of squared deviations).
    """
    j = pl.program_id(1)
    x = x_ref[...].astype(jnp.float32)                       # (rows, lane_tile)

    @pl.when(j == 0)
    def _():
        # Pivot = an actual sample per row, so |x - pivot| ~ O(std):
        # avoids catastrophic cancellation of the raw E[x^2] - mean^2 formula.
        pivot_ref[...] = x[:, 0:1]
        mean_ref[...] = jnp.zeros_like(mean_ref)
        m2_ref[...] = jnp.zeros_like(m2_ref)

    d = x - pivot_ref[...]
    if hw % lane_tile != 0:
        # Edge blocks contain unspecified data (not zeros): mask out-of-bounds
        # lanes of the last column tile so they contribute nothing.
        col = j * lane_tile + jax.lax.broadcasted_iota(jnp.int32, d.shape, 1)
        d = jnp.where(col < hw, d, 0.0)

    mean_ref[...] += jnp.sum(d, axis=-1, keepdims=True)       # shifted sum
    m2_ref[...] += jnp.sum(d * d, axis=-1, keepdims=True)     # shifted sum-sq

    @pl.when(j == pl.num_programs(1) - 1)
    def _():
        nf = jnp.float32(hw)
        s = mean_ref[...]
        m2_ref[...] = m2_ref[...] - s * s / nf                 # per-row M2
        mean_ref[...] = pivot_ref[...] + s / nf                # per-row mean


def _norm_kernel(scale_ref, shift_ref, x_ref, o_ref):
    """Elementwise normalize: out = x * scale_row + shift_row."""
    x = x_ref[...].astype(jnp.float32)
    o_ref[...] = (x * scale_ref[...] + shift_ref[...]).astype(o_ref.dtype)


# ---------------------------------------------------------------------------
# Tiling / device budget helpers
# ---------------------------------------------------------------------------
def _device_budget():
    """Per-chip (target_block_bytes, vmem_limit_bytes), gated on physical VMEM."""
    vmem_cap = 128 * 1024 * 1024
    try:  # trace-time hardware query; fall back to 128 MiB parts if unavailable
        info = pltpu.get_tpu_info()
        vmem_cap = int(getattr(info, "vmem_capacity_bytes", vmem_cap))
    except Exception:
        pass
    if vmem_cap <= 96 * 1024 * 1024:
        # v7x-class (64 MiB VMEM, ~3.2 TB/s HBM): smaller blocks, deeper
        # pipelining, headroom below physical VMEM.
        return 2 * 1024 * 1024, min(48 * 1024 * 1024, (vmem_cap * 3) // 4)
    # v5e / v6e-class (128 MiB VMEM): bigger blocks, fewer grid steps.
    return 8 * 1024 * 1024, 100 * 1024 * 1024


def _choose_tiles(n_rows, hw, itemsize, target_block_bytes):
    """Pick (row_blk, lane_tile) for a (n_rows, hw) view.

    row_blk is a multiple of 8 (or == n_rows), lane_tile is a multiple of 128
    (or == hw), and row_blk * lane_tile * itemsize stays ~<= the byte budget.
    """
    base_rows = min(n_rows, 8)
    if hw * base_rows * itemsize <= target_block_bytes:
        lane_tile = hw                                   # full rows fit
    else:
        lane_tile = (target_block_bytes // (base_rows * itemsize)) // 128 * 128
        lane_tile = max(128, lane_tile)
        if lane_tile >= hw:
            lane_tile = hw
    if n_rows <= 8:
        row_blk = n_rows
    else:
        max_rows = (target_block_bytes // (lane_tile * itemsize)) // 8 * 8
        row_blk = min(max(8, max_rows), (n_rows + 7) // 8 * 8)
    return int(row_blk), int(lane_tile)


def _x_block_spec(block_shape, index_map, num_buffers=None):
    """BlockSpec for the x stream, with optional deeper multi-buffering."""
    if num_buffers is not None and num_buffers > 2:
        try:
            return pl.BlockSpec(block_shape, index_map,
                                pipeline_mode=pl.Buffered(num_buffers))
        except (TypeError, AttributeError):
            pass
    return pl.BlockSpec(block_shape, index_map)


# ---------------------------------------------------------------------------
# Wrapper
# ---------------------------------------------------------------------------
def bn2d_ref(x, gamma, beta, *, target_block_bytes=None, donate_x=False):
    """Pallas equivalent of BN2dRef.forward. x: NCHW; gamma/beta per channel."""
    n_b, n_c, h, w = x.shape
    hw = h * w
    n_rows = n_b * n_c
    n_total = n_b * hw

    gamma_c = jnp.asarray(gamma, jnp.float32).reshape(n_c)
    beta_c = jnp.asarray(beta, jnp.float32).reshape(n_c)

    block_budget, vmem_limit = _device_budget()
    if target_block_bytes is not None:
        block_budget = int(target_block_bytes)

    itemsize = jnp.dtype(x.dtype).itemsize
    row_blk, lane_tile = _choose_tiles(n_rows, hw, itemsize, block_budget)
    num_row_blocks = pl.cdiv(n_rows, row_blk)
    num_col_tiles = pl.cdiv(hw, lane_tile)

    x2 = x.reshape(n_rows, hw)          # contiguous view, no extra HBM traffic

    # ---- Pass 1: per-(n, c)-row mean / M2 (read x once) -------------------
    stats_out_shape = (jax.ShapeDtypeStruct((n_rows, 1), jnp.float32),
                       jax.ShapeDtypeStruct((n_rows, 1), jnp.float32))
    stats_out_specs = (pl.BlockSpec((row_blk, 1), lambda i, j: (i, 0)),
                       pl.BlockSpec((row_blk, 1), lambda i, j: (i, 0)))

    def _stats_call(num_buffers):
        x_spec = _x_block_spec((row_blk, lane_tile), lambda i, j: (i, j),
                               num_buffers)
        return pl.pallas_call(
            functools.partial(_stats_kernel, hw=hw, lane_tile=lane_tile),
            out_shape=stats_out_shape,
            grid=(num_row_blocks, num_col_tiles),
            in_specs=[x_spec],
            out_specs=stats_out_specs,
            scratch_shapes=[pltpu.VMEM((row_blk, 1), jnp.float32)],
            compiler_params=pltpu.CompilerParams(
                dimension_semantics=("parallel", "arbitrary"),
                vmem_limit_bytes=vmem_limit),
        )(x2)

    num_buffers = 3 if num_col_tiles >= 3 else None
    try:
        row_mean, row_m2 = _stats_call(num_buffers)
    except Exception:
        if num_buffers is None:
            raise
        row_mean, row_m2 = _stats_call(None)       # fall back to double buffer

    # ---- Tiny JAX epilogue: combine rows per channel, fold gamma/beta -----
    row_mean = row_mean.reshape(n_b, n_c)
    row_m2 = jnp.maximum(row_m2.reshape(n_b, n_c), 0.0)
    ch_mean = jnp.mean(row_mean, axis=0)                               # (C,)
    # Exact grouped-variance identity: SS_total = sum SS_row + n_row*(mean_row-mean)^2
    ch_m2 = (jnp.sum(row_m2, axis=0)
             + hw * jnp.sum(jnp.square(row_mean - ch_mean[None, :]), axis=0))
    var = jnp.maximum(ch_m2, 0.0) / jnp.float32(n_total - 1)           # unbiased
    inv_std = jax.lax.rsqrt(var + jnp.float32(1e-10))
    scale_c = gamma_c * inv_std
    shift_c = beta_c - ch_mean * scale_c
    scale_rows = jnp.broadcast_to(scale_c[None, :], (n_b, n_c)).reshape(n_rows, 1)
    shift_rows = jnp.broadcast_to(shift_c[None, :], (n_b, n_c)).reshape(n_rows, 1)

    # ---- Pass 2: elementwise normalize (read x once, write once) ----------
    norm_kwargs = {}
    if donate_x:
        # Normalize in place; only valid when the caller no longer needs x.
        norm_kwargs["input_output_aliases"] = {2: 0}
    out2 = pl.pallas_call(
        _norm_kernel,
        out_shape=jax.ShapeDtypeStruct((n_rows, hw), x.dtype),
        grid=(num_row_blocks, num_col_tiles),
        in_specs=[
            pl.BlockSpec((row_blk, 1), lambda i, j: (i, 0)),       # scale
            pl.BlockSpec((row_blk, 1), lambda i, j: (i, 0)),       # shift
            pl.BlockSpec((row_blk, lane_tile), lambda i, j: (i, j)),  # x
        ],
        out_specs=pl.BlockSpec((row_blk, lane_tile), lambda i, j: (i, j)),
        compiler_params=pltpu.CompilerParams(
            dimension_semantics=("parallel", "parallel"),
            vmem_limit_bytes=vmem_limit),
        **norm_kwargs,
    )(scale_rows, shift_rows, x2)

    return out2.reshape(n_b, n_c, h, w)


# ---------------------------------------------------------------------------
# Self-test
# ---------------------------------------------------------------------------
if __name__ == "__main__":
    key = jax.random.PRNGKey(0)
    k1, k2, k3, k4 = jax.random.split(key, 4)

    def _reference(x, gamma, beta):
        n_b, n_c, h, w = x.shape
        xc = x.reshape(n_b, n_c, h * w)
        mean = jnp.mean(xc, axis=(0, 2))
        var = jnp.sum((xc - mean[None, :, None]) ** 2, axis=(0, 2)) / (n_b * h * w - 1)
        mean4 = mean.reshape(1, n_c, 1, 1)
        var4 = var.reshape(1, n_c, 1, 1)
        return gamma * (x - mean4) / jnp.sqrt(var4 + 1e-10) + beta

    # Case 1: module-sized example (batch=2, channels=4, spatial=16x16),
    # device-tuned tiling (single block).
    N, C, H, W = 2, 4, 16, 16
    x = jax.random.normal(k1, (N, C, H, W), dtype=jnp.float32) * 2.0 + 3.0
    gamma = (1.0 + 0.1 * jax.random.normal(k2, (1, C, 1, 1))).astype(jnp.float32)
    beta = (0.1 * jax.random.normal(k3, (1, C, 1, 1))).astype(jnp.float32)
    out = jax.block_until_ready(bn2d_ref(x, gamma, beta))
    ref = _reference(x, gamma, beta)
    assert out.shape == x.shape and out.dtype == x.dtype
    assert jnp.allclose(out, ref, atol=1e-4, rtol=1e-4)

    # Case 2: tiny forced block budget to exercise row/column tiling, partial
    # edge blocks, in-kernel lane masking and the triple-buffered read stream.
    N2, C2, H2, W2 = 3, 5, 20, 20
    x_b = jax.random.normal(k4, (N2, C2, H2, W2), dtype=jnp.float32) - 1.5
    gamma_b = jnp.ones((1, C2, 1, 1), dtype=jnp.float32)
    beta_b = jnp.zeros((1, C2, 1, 1), dtype=jnp.float32)
    out_b = jax.block_until_ready(
        bn2d_ref(x_b, gamma_b, beta_b, target_block_bytes=4096))
    ref_b = _reference(x_b, gamma_b, beta_b)
    assert out_b.shape == x_b.shape and out_b.dtype == x_b.dtype
    assert jnp.allclose(out_b, ref_b, atol=1e-4, rtol=1e-4)

    print("KERNEL_OK")
</pallas_src>

<mosaic_0001>
module attributes {stable_mosaic.version = 11 : i64} {
  func.func @_stats_kernel(%arg0: i32, %arg1: i32, %arg2: memref<8x256xf32, #tpu.memory_space<vmem>>, %arg3: memref<8x1xf32, #tpu.memory_space<vmem>>, %arg4: memref<8x1xf32, #tpu.memory_space<vmem>>, %arg5: memref<8x1xf32, #tpu.memory_space<vmem>>) attributes {dimension_semantics = [#tpu.dimension_semantics<parallel>, #tpu.dimension_semantics<arbitrary>], iteration_bounds = array<i64: 1, 1>, scalar_prefetch = 0 : i64, scratch_operands = 1 : i64, tpu.core_type = #tpu.core_type<tc>, window_params = [{transform_indices = @transform_0, window_bounds = array<i64: 8, 256>}, {transform_indices = @transform_1, window_bounds = array<i64: 8, 1>}, {transform_indices = @transform_2, window_bounds = array<i64: 8, 1>}]} {
    %c0 = arith.constant 0 : index
    %c0_0 = arith.constant 0 : index
    %0 = vector.load %arg2[%c0, %c0_0] : memref<8x256xf32, #tpu.memory_space<vmem>>, vector<8x256xf32>
    %c0_i32 = arith.constant 0 : i32
    %1 = arith.cmpi eq, %arg1, %c0_i32 : i32
    %2 = arith.extui %1 : i1 to i32
    %c0_i32_1 = arith.constant 0 : i32
    %3 = arith.cmpi ne, %2, %c0_i32_1 : i32
    scf.if %3 {
      %21 = vector.extract_strided_slice %0 {offsets = [0, 0], sizes = [8, 1], strides = [1, 1]} : vector<8x256xf32> to vector<8x1xf32>
      %c0_15 = arith.constant 0 : index
      %c0_16 = arith.constant 0 : index
      %22 = vector.load %arg5[%c0_15, %c0_16] : memref<8x1xf32, #tpu.memory_space<vmem>>, vector<8x1xf32>
      tpu.vector_store %arg5[%c0_15, %c0_16], %21 {strides = array<i32>} : memref<8x1xf32, #tpu.memory_space<vmem>>, vector<8x1xf32>,
      %cst_17 = arith.constant 0.000000e+00 : f32
      %23 = vector.broadcast %cst_17 : f32 to vector<8x1xf32>
      %c0_18 = arith.constant 0 : index
      %c0_19 = arith.constant 0 : index
      %24 = vector.load %arg3[%c0_18, %c0_19] : memref<8x1xf32, #tpu.memory_space<vmem>>, vector<8x1xf32>
      tpu.vector_store %arg3[%c0_18, %c0_19], %23 {strides = array<i32>} : memref<8x1xf32, #tpu.memory_space<vmem>>, vector<8x1xf32>,
      %cst_20 = arith.constant 0.000000e+00 : f32
      %25 = vector.broadcast %cst_20 : f32 to vector<8x1xf32>
      %c0_21 = arith.constant 0 : index
      %c0_22 = arith.constant 0 : index
      %26 = vector.load %arg4[%c0_21, %c0_22] : memref<8x1xf32, #tpu.memory_space<vmem>>, vector<8x1xf32>
      tpu.vector_store %arg4[%c0_21, %c0_22], %25 {strides = array<i32>} : memref<8x1xf32, #tpu.memory_space<vmem>>, vector<8x1xf32>,
    } else {
    }
    %c0_2 = arith.constant 0 : index
    %c0_3 = arith.constant 0 : index
    %4 = vector.load %arg5[%c0_2, %c0_3] : memref<8x1xf32, #tpu.memory_space<vmem>>, vector<8x1xf32>
    %5 = vector.broadcast %4 : vector<8x1xf32> to vector<8x256xf32>
    %6 = arith.subf %0, %5 : vector<8x256xf32>
    %c0_4 = arith.constant 0 : index
    %c0_5 = arith.constant 0 : index
    %7 = vector.load %arg3[%c0_4, %c0_5] : memref<8x1xf32, #tpu.memory_space<vmem>>, vector<8x1xf32>
    %cst = arith.constant dense<0.000000e+00> : vector<8xf32>
    %8 = vector.multi_reduction <add>, %6, %cst [1] : vector<8x256xf32> to vector<8xf32>
    %9 = vector.shape_cast %8 : vector<8xf32> to vector<8x1xf32>
    %10 = arith.addf %7, %9 : vector<8x1xf32>
    %c0_6 = arith.constant 0 : index
    %c0_7 = arith.constant 0 : index
    %11 = vector.load %arg3[%c0_6, %c0_7] : memref<8x1xf32, #tpu.memory_space<vmem>>, vector<8x1xf32>
    tpu.vector_store %arg3[%c0_6, %c0_7], %10 {strides = array<i32>} : memref<8x1xf32, #tpu.memory_space<vmem>>, vector<8x1xf32>,
    %c0_8 = arith.constant 0 : index
    %c0_9 = arith.constant 0 : index
    %12 = vector.load %arg4[%c0_8, %c0_9] : memref<8x1xf32, #tpu.memory_space<vmem>>, vector<8x1xf32>
    %13 = arith.mulf %6, %6 : vector<8x256xf32>
    %cst_10 = arith.constant dense<0.000000e+00> : vector<8xf32>
    %14 = vector.multi_reduction <add>, %13, %cst_10 [1] : vector<8x256xf32> to vector<8xf32>
    %15 = vector.shape_cast %14 : vector<8xf32> to vector<8x1xf32>
    %16 = arith.addf %12, %15 : vector<8x1xf32>
    %c0_11 = arith.constant 0 : index
    %c0_12 = arith.constant 0 : index
    %17 = vector.load %arg4[%c0_11, %c0_12] : memref<8x1xf32, #tpu.memory_space<vmem>>, vector<8x1xf32>
    tpu.vector_store %arg4[%c0_11, %c0_12], %16 {strides = array<i32>} : memref<8x1xf32, #tpu.memory_space<vmem>>, vector<8x1xf32>,
    %c0_i32_13 = arith.constant 0 : i32
    %18 = arith.cmpi eq, %arg1, %c0_i32_13 : i32
    %19 = arith.extui %18 : i1 to i32
    %c0_i32_14 = arith.constant 0 : i32
    %20 = arith.cmpi ne, %19, %c0_i32_14 : i32
    scf.if %20 {
      %c0_15 = arith.constant 0 : index
      %c0_16 = arith.constant 0 : index
      %21 = vector.load %arg3[%c0_15, %c0_16] : memref<8x1xf32, #tpu.memory_space<vmem>>, vector<8x1xf32>
      %c0_17 = arith.constant 0 : index
      %c0_18 = arith.constant 0 : index
      %22 = vector.load %arg4[%c0_17, %c0_18] : memref<8x1xf32, #tpu.memory_space<vmem>>, vector<8x1xf32>
      %23 = arith.mulf %21, %21 : vector<8x1xf32>
      %cst_19 = arith.constant 2.560000e+02 : f32
      %24 = vector.broadcast %cst_19 : f32 to vector<8x1xf32>
      %25 = arith.divf %23, %24 : vector<8x1xf32>
      %26 = arith.subf %22, %25 : vector<8x1xf32>
      %c0_20 = arith.constant 0 : index
      %c0_21 = arith.constant 0 : index
      %27 = vector.load %arg4[%c0_20, %c0_21] : memref<8x1xf32, #tpu.memory_space<vmem>>, vector<8x1xf32>
      tpu.vector_store %arg4[%c0_20, %c0_21], %26 {strides = array<i32>} : memref<8x1xf32, #tpu.memory_space<vmem>>, vector<8x1xf32>,
      %c0_22 = arith.constant 0 : index
      %c0_23 = arith.constant 0 : index
      %28 = vector.load %arg5[%c0_22, %c0_23] : memref<8x1xf32, #tpu.memory_space<vmem>>, vector<8x1xf32>
      %cst_24 = arith.constant 2.560000e+02 : f32
      %29 = vector.broadcast %cst_24 : f32 to vector<8x1xf32>
      %30 = arith.divf %21, %29 : vector<8x1xf32>
      %31 = arith.addf %28, %30 : vector<8x1xf32>
      %c0_25 = arith.constant 0 : index
      %c0_26 = arith.constant 0 : index
      %32 = vector.load %arg3[%c0_25, %c0_26] : memref<8x1xf32, #tpu.memory_space<vmem>>, vector<8x1xf32>
      tpu.vector_store %arg3[%c0_25, %c0_26], %31 {strides = array<i32>} : memref<8x1xf32, #tpu.memory_space<vmem>>, vector<8x1xf32>,
    } else {
    }
    return
  }
  func.func @transform_0(%arg0: i32, %arg1: i32) -> (i32, i32) {
    %c0_i32 = arith.constant 0 : i32
    return %arg0, %arg1 : i32, i32
  }
  func.func @transform_1(%arg0: i32, %arg1: i32) -> (i32, i32) {
    %c0_i32 = arith.constant 0 : i32
    %c0_i32_0 = arith.constant 0 : i32
    return %arg0, %c0_i32 : i32, i32
  }
  func.func @transform_2(%arg0: i32, %arg1: i32) -> (i32, i32) {
    %c0_i32 = arith.constant 0 : i32
    %c0_i32_0 = arith.constant 0 : i32
    return %arg0, %c0_i32 : i32, i32
  }
}

</mosaic_0001>

<bundles_post_ra>
// kernel: tpu_custom_call.1
= control target key start
LH: loop header
LB: loop body
LE: loop exit
PB: predicated region body
PF: predicated region fallthrough
CT: control target
= control target key end

     0   :  { %8 = vsyncpa [#allocation4], 0  ;;  %s119_s12 = smov [#allocation3]   ;;  %s178_s0 = inlined_call_operand.hbm [shape: f32[8,256], index: 0, kind: input, shape index: {}]   ;;  %s179_s1 = inlined_call_operand.vmem [shape: f32[8,1], index: 1, kind: output, shape index: {0}]   ;;  %s180_s2 = inlined_call_operand.vmem [shape: f32[8,1], index: 2, kind: output, shape index: {1}]  }
   0x1   :  { %s14_s11 = sshll.u32 %s178_s0, 4  ;;  %s16_s13 = sshll.u32 %s119_s12, 4  ;;  %s15_s11 = int_to_ptr.hbm [resolvable:$true] %s14_s11  ;;  %s17_s13 = int_to_ptr.vmem [resolvable:$true] %s16_s13 }
   0x2   :  { %19 = dma.hbm_to_vmem [thread:$0]  %s15_s11, 256, %s17_s13, [#allocation4]  }
   0x3   :  { %117 = dma.done.wait [#allocation4], 256  }
   0x4   :  { %118 = vsyncadd [#allocation4], 4294967040  ;;  %v120_v0 = vmov 0   ;;  %vm30_vm0 = vcmask 7168   ;;  %v24_v1 = vld [vmem:[#allocation3] sm:$0xff]  ;;  %v121_v3 = vmov 0.0  }
   0x5   :  { %90 = vset.pattern.permute.xlu0 %v120_v0  ;;  %31 = vst.msk [vmem:[#allocation2] sm:$0xff] %vm30_vm0, %v24_v1  ;;  %v25_v4 = vld [vmem:[#allocation3 + $0x8] sm:$0xff]  ;;  %v122_v12 = vmov 256.0  }
   0x6   :  { %32 = vst.msk [vmem:[%s179_s1] sm:$0xff] %vm30_vm0, %v121_v3  ;;  %91 = vrcp.f32 %v122_v12 }
   0x7   :  { %33 = vst.msk [vmem:[%s180_s2] sm:$0xff] %vm30_vm0, %v121_v3 }
   0xc   :  { %v34_v2 = vld [vmem:[#allocation2] sm:$0xff]  ;;  %v92_v13 = vpop.eup %91 }
   0xd   :  { %37 = vperm.xlu0 %90, %v34_v2   ;;  %v64_v14 = vmul.f32 256.0, %v92_v13  ;;  %v42_v16 = vld [vmem:[%s179_s1] sm:$0xff]  ;;  %vm68_vm1 = vweird.f32 %v92_v13 }
   0xe   :  { %v49_v19 = vld [vmem:[%s180_s2] sm:$0xff] }
   0xf   :  { %v65_v15 = vsub.f32 1.0, %v64_v14 }
  0x11   :  { %v66_v17 = vmul.f32 %v92_v13, %v65_v15 }
  0x13   :  { %v67_v23 = vadd.f32 %v92_v13, %v66_v17 }
  0x15   :  { %v69_v24 = vsel %vm68_vm1, %v92_v13, %v67_v23 }
  0x7f   :  { %v38_v5 = vpop.permute.xlu0 %37 }
  0x80   :  { %v40_v6 = vsub.f32 %v24_v1, %v38_v5  ;;  %v41_v7 = vsub.f32 %v25_v4, %v38_v5 }
  0x82   :  { %v43_v8 = vadd.f32 %v41_v7, %v40_v6  ;;  %v50_v9 = vmul.f32 %v40_v6, %v40_v6  ;;  %v51_v10 = vmul.f32 %v41_v7, %v41_v7 }
  0x84   :  { %44 = vadd.xlane.f32.xlu0 %v43_v8  ;;  %v52_v11 = vadd.f32 %v51_v10, %v50_v9 }
  0x86   :  { %53 = vadd.xlane.f32.xlu1 %v52_v11 }
  0xf7   :  { %v45_v18 = vpop.xlane.xlu0 %44 }
  0xf8   :  { %v46_v20 = vadd.f32 %v45_v18, %v42_v16 }
  0xf9   :  { %v54_v21 = vpop.xlane.xlu1 %53 }
  0xfa   :  { %48 = vst.msk [vmem:[%s179_s1] sm:$0xff] %vm30_vm0, %v46_v20  ;;  %v55_v22 = vadd.f32 %v54_v21, %v49_v19 }
  0xfc   :  { %56 = vst.msk [vmem:[%s180_s2] sm:$0xff] %vm30_vm0, %v55_v22 }
 0x101   :  { %v60_v25 = vld [vmem:[%s179_s1] sm:$0xff] }
 0x102   :  { %v62_v26 = vmul.f32 %v60_v25, %v60_v25  ;;  %v74_v27 = vmul.f32 %v69_v24, %v60_v25 }
 0x103   :  { %v61_v30 = vld [vmem:[%s180_s2] sm:$0xff] }
 0x104   :  { %v75_v28 = vadd.f32 %v74_v27, %v34_v2  ;;  %v70_v29 = vmul.f32 %v69_v24, %v62_v26 }
 0x106   :  { %76 = vst.msk [vmem:[%s179_s1] sm:$0xff] %vm30_vm0, %v75_v28  ;;  %v71_v31 = vsub.f32 %v61_v30, %v70_v29 }
 0x108   :  { %72 = vst.msk [vmem:[%s180_s2] sm:$0xff] %vm30_vm0, %v71_v31 }
 0x109   :  { %85 = vsyncpa [#allocation4], 1 }

</bundles_post_ra>
